<compile_context>
chip_gen: v6e
topology: v6e:2x2x1
jax: 0.10.0
libtpu: 0.0.40
codegen_flags: <defaults>
</compile_context>

<pallas_src>
import numpy as np

import jax
import jax.numpy as jnp
from jax.experimental import pallas as pl
from jax.experimental.pallas import tpu as pltpu

LN_EPS = 1e-5
BN_EPS = 1e-5
NEG_INF = -1e30

_CPARAMS = pltpu.CompilerParams(dimension_semantics=("parallel",))


# ----------------------------------------------------------------------------
# in-kernel helpers
# ----------------------------------------------------------------------------
def _layernorm(x, gamma, beta):
    mu = jnp.mean(x, axis=-1, keepdims=True)
    var = jnp.mean((x - mu) ** 2, axis=-1, keepdims=True)
    return (x - mu) * jax.lax.rsqrt(var + LN_EPS) * gamma + beta


def _silu(x):
    return x * jax.nn.sigmoid(x)


def _bf16(x):
    return x.astype(jnp.bfloat16)


def _mm(a, w_ref, b_ref=None):
    # bf16 x bf16 MXU matmul with f32 accumulation
    out = jnp.dot(_bf16(a), w_ref[...], preferred_element_type=jnp.float32)
    if b_ref is not None:
        out = out + b_ref[...]
    return out


# ----------------------------------------------------------------------------
# Pallas kernels
# ----------------------------------------------------------------------------
def frontend_kernel(x_ref, w_ref, b_ref, o_ref):
    # TODO(synk): cfg.frontend() is not specified in the reference module; a
    # linear projection (no time subsampling) is used as a stand-in frontend.
    o_ref[0] = _mm(x_ref[0], w_ref, b_ref)


def make_block_kernel(num_heads, head_dim, seq_len, feat_dim, kernel_size, active):
    """Fused Conformer block kernel (eval mode, module_gates = 1).

    `active` is a static 4-tuple of bools: (ff1, conv, mhsa, ff2).  Inactive
    modules are skipped entirely (direct_jump semantics) and their weights are
    not passed to the kernel at all.
    """
    scale = 1.0 / float(np.sqrt(head_dim))
    pad = (kernel_size - 1) // 2
    act_ff1, act_conv, act_mhsa, act_ff2 = active

    def kernel(*refs):
        o_ref = refs[-1]
        it = iter(refs[:-1])
        x_ref = next(it)
        m_ref = next(it)

        x = x_ref[0]                                         # [T, F] f32 residual

        # ---- positionwise FF 1:  x = x + 0.5 * W2 @ SiLU(W1 @ LN(x)) --------
        if act_ff1:
            ln_g, ln_b, w1, b1, w2, b2 = [next(it) for _ in range(6)]
            h = _layernorm(x, ln_g[...], ln_b[...])
            h = _silu(_mm(h, w1, b1))
            x = x + 0.5 * _mm(h, w2, b2)

        # ---- conv module: LN -> PW conv -> GLU -> DW conv -> BN -> SiLU -> PW conv ----
        if act_conv:
            (ln_g, ln_b, w1, b1, dw_w, dw_b,
             bn_g, bn_b, bn_m, bn_v, w2, b2) = [next(it) for _ in range(12)]
            h = _layernorm(x, ln_g[...], ln_b[...])
            p = _mm(h, w1, b1)                               # [T, 2F]
            g = p[:, :feat_dim] * jax.nn.sigmoid(p[:, feat_dim:])   # GLU -> [T, F]

            # depthwise conv along time: XLU roll + boundary mask (no padded copies)
            tidx = jax.lax.broadcasted_iota(jnp.int32, (seq_len, 1), 0)
            dw = dw_w[...]                                   # [K, F] f32
            acc = jnp.zeros((seq_len, feat_dim), jnp.float32)
            for k in range(kernel_size):
                off = k - pad                                # tap uses g[t + off]
                shift = (-off) % seq_len
                rolled = pltpu.roll(g, shift, axis=0) if shift else g
                valid = jnp.logical_and(tidx + off >= 0, tidx + off < seq_len)
                acc = acc + jnp.where(valid, rolled, 0.0) * dw[k]
            acc = acc + dw_b[...]

            # BatchNorm1d in eval mode (running statistics)
            hn = (acc - bn_m[...]) * jax.lax.rsqrt(bn_v[...] + BN_EPS)
            hn = _silu(hn * bn_g[...] + bn_b[...])
            x = x + _mm(hn, w2, b2)

        # ---- multi-head self-attention (key padding mask) --------------------
        if act_mhsa:
            ln_g, ln_b, wqkv, bqkv, wo, bo = [next(it) for _ in range(6)]
            m = m_ref[0]                                      # [1, T], 1.0 = valid key
            bias = jnp.where(m > 0.5, 0.0, NEG_INF)           # additive key bias [1, T]
            h = _layernorm(x, ln_g[...], ln_b[...])
            qkv = _mm(h, wqkv, bqkv)                          # fused QKV -> [T, 3F]
            q = qkv[:, :feat_dim] * scale                     # pre-scale q once
            kmat = qkv[:, feat_dim:2 * feat_dim]
            v = qkv[:, 2 * feat_dim:]

            att = jnp.zeros((seq_len, feat_dim), jnp.float32)
            for hd in range(num_heads):
                sl = slice(hd * head_dim, (hd + 1) * head_dim)
                s = jnp.dot(_bf16(q[:, sl]), _bf16(kmat[:, sl]).T,
                            preferred_element_type=jnp.float32) + bias
                s = s - jnp.max(s, axis=-1, keepdims=True)
                e = jnp.exp(s)
                p_att = e * pl.reciprocal(jnp.sum(e, axis=-1, keepdims=True),
                                          approx=True)
                ctx = jnp.dot(_bf16(p_att), _bf16(v[:, sl]),
                              preferred_element_type=jnp.float32)        # [T, d]
                # accumulate directly through the matching Wo row block (no concat)
                att = att + jnp.dot(_bf16(ctx),
                                    wo[pl.ds(hd * head_dim, head_dim), :],
                                    preferred_element_type=jnp.float32)
            x = x + att + bo[...]

        # ---- positionwise FF 2 ------------------------------------------------
        if act_ff2:
            ln_g, ln_b, w1, b1, w2, b2 = [next(it) for _ in range(6)]
            h = _layernorm(x, ln_g[...], ln_b[...])
            h = _silu(_mm(h, w1, b1))
            x = x + 0.5 * _mm(h, w2, b2)

        # ---- final LayerNorm (always applied) ---------------------------------
        fln_g = next(it)
        fln_b = next(it)
        o_ref[0] = _layernorm(x, fln_g[...], fln_b[...])

    return kernel


# ----------------------------------------------------------------------------
# pallas_call wrappers (cached + jitted per signature to avoid recompiles)
# ----------------------------------------------------------------------------
def _row_spec(n):
    return pl.BlockSpec((1, n), lambda b: (0, 0))


def _mat_spec(m, n):
    return pl.BlockSpec((m, n), lambda b: (0, 0))


def _bt_spec(t, f):
    return pl.BlockSpec((1, t, f), lambda b: (b, 0, 0))


_FRONTEND_FN_CACHE = {}
_BLOCK_FN_CACHE = {}


def _get_frontend_fn(B, T, F_in, F):
    key = (B, T, F_in, F)
    fn = _FRONTEND_FN_CACHE.get(key)
    if fn is None:
        fn = jax.jit(pl.pallas_call(
            frontend_kernel,
            out_shape=jax.ShapeDtypeStruct((B, T, F), jnp.float32),
            grid=(B,),
            in_specs=[_bt_spec(T, F_in), _mat_spec(F_in, F), _row_spec(F)],
            out_specs=_bt_spec(T, F),
            compiler_params=_CPARAMS,
        ))
        _FRONTEND_FN_CACHE[key] = fn
    return fn


def _get_block_fn(B, T, F, H, K, num_heads, active):
    key = (B, T, F, H, K, num_heads, active)
    fn = _BLOCK_FN_CACHE.get(key)
    if fn is not None:
        return fn

    head_dim = F // num_heads
    kernel = make_block_kernel(num_heads, head_dim, T, F, K, active)

    specs = [_bt_spec(T, F), pl.BlockSpec((1, 1, T), lambda b: (b, 0, 0))]
    if active[0]:
        specs += [_row_spec(F), _row_spec(F), _mat_spec(F, H), _row_spec(H),
                  _mat_spec(H, F), _row_spec(F)]
    if active[1]:
        specs += [_row_spec(F), _row_spec(F), _mat_spec(F, 2 * F), _row_spec(2 * F),
                  _mat_spec(K, F), _row_spec(F),
                  _row_spec(F), _row_spec(F), _row_spec(F), _row_spec(F),
                  _mat_spec(F, F), _row_spec(F)]
    if active[2]:
        specs += [_row_spec(F), _row_spec(F), _mat_spec(F, 3 * F), _row_spec(3 * F),
                  _mat_spec(F, F), _row_spec(F)]
    if active[3]:
        specs += [_row_spec(F), _row_spec(F), _mat_spec(F, H), _row_spec(H),
                  _mat_spec(H, F), _row_spec(F)]
    specs += [_row_spec(F), _row_spec(F)]        # final LayerNorm

    fn = jax.jit(pl.pallas_call(
        kernel,
        out_shape=jax.ShapeDtypeStruct((B, T, F), jnp.float32),
        grid=(B,),
        in_specs=specs,
        out_specs=_bt_spec(T, F),
        compiler_params=_CPARAMS,
    ))
    _BLOCK_FN_CACHE[key] = fn
    return fn


def frontend_call(x, p):
    B, T, F_in = x.shape
    F = p["w"].shape[1]
    return _get_frontend_fn(B, T, F_in, F)(x, p["w"], p["b"])


def conformer_block_call(x, mask3, bp, num_heads, dropout_indices):
    """One fused Conformer block (eval path; skipped modules = direct_jump)."""
    B, T, F = x.shape
    K = bp["conv"]["dw_w"].shape[0]
    H = bp["ff1"]["w1"].shape[1]
    active = tuple(j not in dropout_indices for j in range(4))

    fn = _get_block_fn(B, T, F, H, K, num_heads, active)

    args = [x, mask3]
    if active[0]:
        p = bp["ff1"]
        args += [p["ln_g"], p["ln_b"], p["w1"], p["b1"], p["w2"], p["b2"]]
    if active[1]:
        p = bp["conv"]
        args += [p["ln_g"], p["ln_b"], p["w1"], p["b1"], p["dw_w"], p["dw_b"],
                 p["bn_g"], p["bn_b"], p["bn_m"], p["bn_v"], p["w2"], p["b2"]]
    if active[2]:
        p = bp["mhsa"]
        args += [p["ln_g"], p["ln_b"], p["wqkv"], p["bqkv"], p["wo"], p["bo"]]
    if active[3]:
        p = bp["ff2"]
        args += [p["ln_g"], p["ln_b"], p["w1"], p["b1"], p["w2"], p["b2"]]
    p = bp["final_ln"]
    args += [p["g"], p["b"]]
    return fn(*args)


# ----------------------------------------------------------------------------
# Conformer encoder glue (eval-mode forward semantics)
# ----------------------------------------------------------------------------
def conformer_encoder_forward(params, data, sequence_mask, num_heads,
                              small_model_num_mods, medium_model_num_mods,
                              recog_num_mods):
    """Eval-mode forward of ConformerEncoderV1. Returns ([y, x, z], seq_mask)."""
    num_layers = len(params["blocks"])
    total_mods = 4 * num_layers
    # TODO(synk): the original code hardcodes 48 total modules (12 layers);
    # generalized here to 4 * num_layers so the small test config is consistent.

    x = frontend_call(data, params["frontend"])
    y = x
    z = x
    mask3 = sequence_mask[:, None, :].astype(jnp.float32)   # [B, 1, T]

    gates = np.asarray(params["gates"])
    small_remove = np.argsort(gates, kind="stable")[: total_mods - small_model_num_mods]
    medium_remove = np.argsort(gates, kind="stable")[: total_mods - medium_model_num_mods]
    small_remove = set(int(i) for i in small_remove)
    medium_remove = set(int(i) for i in medium_remove)

    if recog_num_mods == total_mods:
        for i in range(num_layers):
            x = conformer_block_call(x, mask3, params["blocks"][i], num_heads, [])
    if recog_num_mods == small_model_num_mods:
        for i in range(num_layers):
            drop = [j for j in range(4) if (4 * i + j) in small_remove]
            y = conformer_block_call(y, mask3, params["blocks"][i], num_heads, drop)
    if recog_num_mods == medium_model_num_mods:
        for i in range(num_layers):
            drop = [j for j in range(4) if (4 * i + j) in medium_remove]
            z = conformer_block_call(z, mask3, params["blocks"][i], num_heads, drop)

    return [y, x, z], sequence_mask


# ----------------------------------------------------------------------------
# deterministic parameter init (matmul weights bf16, vector params as [1, N] f32)
# ----------------------------------------------------------------------------
def init_params(key, num_layers, f_in, f_model, ff_dim, conv_kernel_size):
    def dense(k, shape, scale=0.05):
        return (scale * jax.random.normal(k, shape)).astype(jnp.bfloat16)

    def row_zeros(n):
        return jnp.zeros((1, n), jnp.float32)

    def row_ones(n):
        return jnp.ones((1, n), jnp.float32)

    keys = iter(jax.random.split(key, 8 + num_layers * 16))
    params = {
        "frontend": {"w": dense(next(keys), (f_in, f_model)),
                     "b": row_zeros(f_model)},
        "gates": jnp.full((4 * num_layers,), 0.5, jnp.float32),
        "blocks": [],
    }

    def ff_params():
        return {"ln_g": row_ones(f_model), "ln_b": row_zeros(f_model),
                "w1": dense(next(keys), (f_model, ff_dim)), "b1": row_zeros(ff_dim),
                "w2": dense(next(keys), (ff_dim, f_model)), "b2": row_zeros(f_model)}

    for _ in range(num_layers):
        block = {
            "ff1": ff_params(),
            "mhsa": {"ln_g": row_ones(f_model), "ln_b": row_zeros(f_model),
                     "wqkv": dense(next(keys), (f_model, 3 * f_model)),   # fused Q|K|V
                     "bqkv": row_zeros(3 * f_model),
                     "wo": dense(next(keys), (f_model, f_model)),
                     "bo": row_zeros(f_model)},
            "conv": {"ln_g": row_ones(f_model), "ln_b": row_zeros(f_model),
                     "w1": dense(next(keys), (f_model, 2 * f_model)),
                     "b1": row_zeros(2 * f_model),
                     "dw_w": (0.05 * jax.random.normal(
                         next(keys), (conv_kernel_size, f_model))).astype(jnp.float32),
                     "dw_b": row_zeros(f_model),
                     "bn_g": row_ones(f_model), "bn_b": row_zeros(f_model),
                     "bn_m": row_zeros(f_model), "bn_v": row_ones(f_model),
                     "w2": dense(next(keys), (f_model, f_model)),
                     "b2": row_zeros(f_model)},
            "ff2": ff_params(),
            "final_ln": {"g": row_ones(f_model), "b": row_zeros(f_model)},
        }
        params["blocks"].append(block)
    return params


# ----------------------------------------------------------------------------
if __name__ == "__main__":
    # small, lane-dense test config (F multiple of 128, T multiple of 8)
    B, T, F_IN = 2, 32, 128
    F_MODEL, FF_DIM, NUM_HEADS, CONV_K = 128, 256, 4, 7
    NUM_LAYERS = 2
    TOTAL_MODS = 4 * NUM_LAYERS
    SMALL_MODS, MEDIUM_MODS = 4, 6

    key = jax.random.PRNGKey(0)
    k_data, k_params = jax.random.split(key)
    data = jax.random.normal(k_data, (B, T, F_IN), dtype=jnp.float32)
    seq_lens = np.array([32, 25], dtype=np.int32)
    sequence_mask = (np.arange(T)[None, :] < seq_lens[:, None]).astype(np.float32)
    sequence_mask = jnp.asarray(sequence_mask)

    params = init_params(k_params, NUM_LAYERS, F_IN, F_MODEL, FF_DIM, CONV_K)

    # full-model branch (recog_num_mods == total number of modules)
    (y_full, x_full, z_full), out_mask = conformer_encoder_forward(
        params, data, sequence_mask, NUM_HEADS,
        SMALL_MODS, MEDIUM_MODS, recog_num_mods=TOTAL_MODS)
    # small-model branch (exercises module-skip / direct_jump path)
    (y_small, x_small, z_small), _ = conformer_encoder_forward(
        params, data, sequence_mask, NUM_HEADS,
        SMALL_MODS, MEDIUM_MODS, recog_num_mods=SMALL_MODS)

    for t in (y_full, x_full, z_full, y_small, x_small, z_small, out_mask):
        jax.block_until_ready(t)

    assert x_full.shape == (B, T, F_MODEL)
    assert y_small.shape == (B, T, F_MODEL)
    assert bool(jnp.all(jnp.isfinite(x_full))) and bool(jnp.all(jnp.isfinite(y_small)))
    print("KERNEL_OK")
</pallas_src>

<mosaic_0001>
module attributes {stable_mosaic.version = 11 : i64} {
  func.func @frontend_kernel(%arg0: i32, %arg1: memref<1x32x128xf32, #tpu.memory_space<vmem>>, %arg2: memref<128x128xbf16, #tpu.memory_space<vmem>>, %arg3: memref<1x128xf32, #tpu.memory_space<vmem>>, %arg4: memref<1x32x128xf32, #tpu.memory_space<vmem>>) attributes {dimension_semantics = [#tpu.dimension_semantics<parallel>], iteration_bounds = array<i64: 2>, scalar_prefetch = 0 : i64, scratch_operands = 0 : i64, tpu.core_type = #tpu.core_type<tc>, window_params = [{transform_indices = @transform_0, window_bounds = array<i64: 1, 32, 128>}, {pipeline_mode = #tpu.pipeline_mode<synchronous>, transform_indices = @transform_1, window_bounds = array<i64: 128, 128>}, {pipeline_mode = #tpu.pipeline_mode<synchronous>, transform_indices = @transform_2, window_bounds = array<i64: 1, 128>}, {transform_indices = @transform_3, window_bounds = array<i64: 1, 32, 128>}]} {
    %c0 = arith.constant 0 : index
    %c0_0 = arith.constant 0 : index
    %c0_1 = arith.constant 0 : index
    %0 = vector.load %arg1[%c0, %c0_0, %c0_1] : memref<1x32x128xf32, #tpu.memory_space<vmem>>, vector<1x32x128xf32>
    %1 = vector.shape_cast %0 : vector<1x32x128xf32> to vector<32x128xf32>
    %2 = arith.truncf %1 : vector<32x128xf32> to vector<32x128xbf16>
    %c0_2 = arith.constant 0 : index
    %c0_3 = arith.constant 0 : index
    %3 = vector.load %arg2[%c0_2, %c0_3] : memref<128x128xbf16, #tpu.memory_space<vmem>>, vector<128x128xbf16>
    %cst = arith.constant dense<0.000000e+00> : vector<32x128xf32>
    %4 = tpu.matmul %2, %3, %cst {dimension_numbers = #tpu.dot_dimension_numbers<[1], [0], [0], [1], [0, 0, 1, 1], [], []>} : vector<32x128xbf16>, vector<128x128xbf16>, vector<32x128xf32> -> vector<32x128xf32>
    %c0_4 = arith.constant 0 : index
    %c0_5 = arith.constant 0 : index
    %5 = vector.load %arg3[%c0_4, %c0_5] : memref<1x128xf32, #tpu.memory_space<vmem>>, vector<1x128xf32>
    %6 = vector.broadcast %5 : vector<1x128xf32> to vector<32x128xf32>
    %7 = arith.addf %4, %6 : vector<32x128xf32>
    %c0_6 = arith.constant 0 : index
    %c0_7 = arith.constant 0 : index
    %c0_8 = arith.constant 0 : index
    %8 = vector.load %arg4[%c0_6, %c0_7, %c0_8] : memref<1x32x128xf32, #tpu.memory_space<vmem>>, vector<1x32x128xf32>
    %9 = vector.shape_cast %8 : vector<1x32x128xf32> to vector<32x128xf32>
    %10 = vector.shape_cast %7 : vector<32x128xf32> to vector<1x32x128xf32>
    tpu.vector_store %arg4[%c0_6, %c0_7, %c0_8], %10 {strides = array<i32>} : memref<1x32x128xf32, #tpu.memory_space<vmem>>, vector<1x32x128xf32>,
    return
  }
  func.func @transform_0(%arg0: i32) -> (i32, i32, i32) {
    %c0_i32 = arith.constant 0 : i32
    %c0_i32_0 = arith.constant 0 : i32
    %c0_i32_1 = arith.constant 0 : i32
    return %arg0, %c0_i32, %c0_i32_0 : i32, i32, i32
  }
  func.func @transform_1(%arg0: i32) -> (i32, i32) {
    %c0_i32 = arith.constant 0 : i32
    %c0_i32_0 = arith.constant 0 : i32
    %c0_i32_1 = arith.constant 0 : i32
    return %c0_i32, %c0_i32_0 : i32, i32
  }
  func.func @transform_2(%arg0: i32) -> (i32, i32) {
    %c0_i32 = arith.constant 0 : i32
    %c0_i32_0 = arith.constant 0 : i32
    %c0_i32_1 = arith.constant 0 : i32
    return %c0_i32, %c0_i32_0 : i32, i32
  }
  func.func @transform_3(%arg0: i32) -> (i32, i32, i32) {
    %c0_i32 = arith.constant 0 : i32
    %c0_i32_0 = arith.constant 0 : i32
    %c0_i32_1 = arith.constant 0 : i32
    return %arg0, %c0_i32, %c0_i32_0 : i32, i32, i32
  }
}

</mosaic_0001>

<bundles_post_ra>
// kernel: tpu_custom_call.1
= control target key start
LH: loop header
LB: loop body
LE: loop exit
PB: predicated region body
PF: predicated region fallthrough
CT: control target
= control target key end

     0   :  { %8 = vsyncpa [#allocation3], 0  ;;  %s903_s0 = inlined_call_operand.hbm [shape: f32[2,32,128], index: 0, kind: input, shape index: {}]   ;;  %s904_s1 = inlined_call_operand.hbm [shape: bf16[128,128], index: 1, kind: input, shape index: {}]   ;;  %s905_s2 = inlined_call_operand.vmem [shape: f32[1,128], index: 2, kind: input, shape index: {}]   ;;  %s906_s3 = inlined_call_operand.hbm [shape: f32[2,32,128], index: 3, kind: output, shape index: {}]  }
   0x1   :  { %10 = vsyncpa [#allocation3 + $0x1], 0 }
   0x2   :  { %11 = vsyncpa [#allocation6], 0 }
   0x3   :  { %12 = vsyncpa [#allocation4], 0 }
   0x4   :  { %14 = vsyncpa [#allocation4 + $0x1], 0  ;;  %s713_s12 = smov 0   ;;  %s715_s13 = smov 0  }
   0x5   :  { %s717_s14 = smov 0   ;;  %s719_s15 = smov 0  }
   0x6 LB: > { %s734_s16 = sadd.s32 4294967295, %s682_s15   ;;  %s432_s17 = sadd.s32 4294967294, %s682_s15   ;;  %s682_s15 = sphi %s719_s15, %s928_s15   ;;  %s678_s14 = sphi %s717_s14, %s927_s14   ;;  %s674_s13 = sphi %s715_s13, %s926_s13   ;;  %s670_s12 = sphi %s713_s12, %s925_s12  }
   0x7   : > { %p40_p0 = scmp.ne.s32.totalorder %s674_s13, %s670_s12  ;;  %p907_p1 = scmp.eq.s32.totalorder %s734_s16, 0 }
   0x8   : > { %p112_p3 = scmp.eq.s32.totalorder %s432_s17, 1  ;;  %p433_p5 = scmp.ge.s32.totalorder %s682_s15, 1 }
   0x9   : > { %p743_p4 = por %p907_p1, %p40_p0  ;;  %p119_p7 = scmp.lt.s32.totalorder %s682_s15, 3 }
   0xa   : > { %p748_p6 = por %p112_p3, %p40_p0  ;;  %s684_s21 = smov [#allocation5]  }
   0xb   : > { %s911_s18 = scalar_select %p743_p4, 1, 0 }
   0xc   : > { %s912_s19 = scalar_select %p748_p6, 1, 0 }
   0xd   : > { %p753_p8 = pnand %p433_p5, %p119_p7  ;;  %s131_s22 = sshll.u32 %s684_s21, 4  ;;  %s132_s22 = int_to_ptr.vmem [resolvable:$true] %s131_s22 }
   0xe   : > { %s767_s24 = sadd.s32 1, %s682_s15   ;;  %s27_s25 = sadd.s32 1, %s678_s14 }
   0xf   : > { %s913_s20 = scalar_select %p753_p8, 1, 0 }
  0x10   : > { %p497_p9 = pneg %p753_p8  ;;  %s24_s26 = ssub.s32 %s682_s15, %s767_s24 }
  0x11   : > { %s571_s27 = scalar_lea.vmem %s132_s22, 1024  ;;  %p579_p5 = scmp.lt.s32.totalorder %s132_s22, %s132_s22 }
  0x12   : > { %p762_p11 = pnand %p497_p9, %p907_p1  ;;  %p572_p13 = scmp.ne.s32.totalorder %s132_s22, %s571_s27 }
  0x13   : > { %p580_p7 = scmp.lt.s32.totalorder %s571_s27, %s571_s27 }
  0x14   : > { %p562_p12 = pneg %p762_p11 }
  0x15   : > { %p581_p10 = por %p580_p7, %p579_p5 }
  0x16   : > { %p574_p0 = pnand %p572_p13, %p562_p12 }
  0x18   : > { %p575_p3 = pneg %p574_p0 }
  0x1a   : > { %p582_p2 = pnand %p581_p10, %p575_p3 }
  0x1c   : > { %585 = shalt.err (!%p582_p2)
}
  0x1d   : > { %s685_s28 = smov 64   ;;  %s686_s29 = smov 4  }
  0x1e   : > { %500 = dma.hbm_to_vmem [thread:$0]  (!%p762_p11), %s904_s1, 1024, %s132_s22, [#allocation6], %s685_s28, %s685_s28, %s686_s29  }
  0x1f   : > { %p25_p9 = scmp.eq.s32.totalorder %s24_s26, 0  ;;  %p34_p12 = scmp.ne.s32.totalorder %s678_s14, %s674_s13 }
  0x20   : > { %p35_p10 = scmp.eq.s32.totalorder %s682_s15, 0  ;;  %p510_p2 = scmp.lt.s32.totalorder %s682_s15, 2 }
  0x21   : > { %s784_s5 = scalar_select %p25_p9, %s678_s14, %s27_s25  }
  0x22   : > { %p36_p13 = por %p35_p10, %p34_p12  ;;  %p915_p0 = scmp.eq.s32.totalorder %s734_s16, 1 }
  0x23   : > { %s148_s7 = sand.u32 1, %s678_s14   ;;  %s457_s8 = sshll.u32 %s682_s15, 9 }
  0x24   : > { %p788_p3 = por %p915_p0, %p34_p12  ;;  %s436_s9 = sshll.u32 %s148_s7, 5 }
  0x25   : > { %s797_s17 = scalar_lea.hbm %s903_s0, %s457_s8  ;;  %s152_s21 = scalar_lea.vmem [#allocation2], %s436_s9 }
  0x26   : > { %s916_s6 = scalar_select %p788_p3, 1, 0 }
  0x27   : > { %s159_s22 = sshll.u32 %s152_s21, 4  ;;  %p799_p11 = pnand %p510_p2, %p36_p13  ;;  %s803_s22 = int_to_ptr.vmem [resolvable:$true] %s159_s22 }
  0x28   : > { %s805_s25 = scalar_lea.sflag [#allocation3], %s148_s7  ;;  %s586_s26 = scalar_lea.hbm %s797_s17, 512 }
  0x29   : > { %p587_p5 = scmp.ne.s32.totalorder %s797_s17, %s586_s26  ;;  %p588_p7 = pneg %p799_p11 }
  0x2a   : > { %s591_s29 = scalar_lea.hbm %s903_s0, 1024  ;;  %p592_p10 = scmp.lt.s32.totalorder %s797_s17, %s903_s0 }
  0x2b   : > { %p589_p9 = pnand %p588_p7, %p587_p5  ;;  %p593_p2 = scmp.lt.s32.totalorder %s591_s29, %s586_s26 }
  0x2d   : > { %p590_p12 = pneg %p589_p9  ;;  %p594_p13 = por %p593_p2, %p592_p10 }
  0x2f   : > { %p595_p0 = pnand %p594_p13, %p590_p12 }
  0x31   : > { %598 = shalt.err (!%p595_p0)
}
  0x32   : > { %s599_s7 = scalar_lea.vmem %s803_s22, 512  ;;  %s687_s8 = smov [#allocation2]  }
  0x33   : > { %p600_p1 = scmp.ne.s32.totalorder %s803_s22, %s599_s7  ;;  %s604_s9 = sshll.u32 %s687_s8, 4  ;;  %s605_s9 = int_to_ptr.vmem [resolvable:$false] %s604_s9 }
  0x34   : > { %s606_s10 = scalar_lea.vmem %s605_s9, 1024  ;;  %p607_p9 = scmp.lt.s32.totalorder %s803_s22, %s605_s9 }
  0x35   : > { %p602_p6 = pnand %p600_p1, %p588_p7  ;;  %p608_p3 = scmp.lt.s32.totalorder %s606_s10, %s599_s7 }
  0x37   : > { %p603_p5 = pneg %p602_p6  ;;  %p609_p4 = por %p608_p3, %p607_p9 }
  0x39   : > { %p610_p8 = pnand %p609_p4, %p603_p5 }
  0x3b   : > { %613 = shalt.err (!%p610_p8)
}
  0x3c   : > { %s688_s11 = smov 128   ;;  %s689_s21 = smov 8  }
  0x3d   : > { %504 = dma.hbm_to_vmem [thread:$0]  (!%p799_p11), %s797_s17, 512, %s803_s22, %s805_s25, %s688_s11, %s688_s11, %s689_s21  }
  0x3e   : > { %p918_p1 = scmp.ne.s32.totalorder %s913_s20, 0 }
  0x3f   : > { %s829_s26 = sand.u32 (!%p918_p1), 1, %s674_s13   ;;  %p919_p4 = scmp.ne.s32.totalorder (!%p918_p1), %s911_s18, 0 }
  0x40   : > { %171 = sbr.rel (%p918_p1) target bundleno = 321 (0x141), region = 32  ;;  %s440_s27 = sshll.u32 (!%p918_p1), %s829_s26, 5 }
  0x41   : > { %s174_s28 = scalar_lea.sflag (!%p918_p1), [#allocation3], %s829_s26  ;;  %s835_s29 = scalar_lea.vmem (!%p918_p1), [#allocation2], %s440_s27 }
  0x45   : > { %657 = dma.done.wait (%p919_p4), %s174_s28, 512  }
  0x46   : > { %659 = vsyncadd (%p919_p4), %s174_s28, 4294966784  ;;  %p920_p6 = scmp.eq.s32.totalorder %s734_s16, 0 }
  0x48   : > { %661 = dma.done.wait (%p920_p6), [#allocation6], 1024   ;;  %p921_p8 = pmov %p920_p6 }
  0x49   : > { %v552_v0 = vld [vmem:[#allocation5 + $0x38] sm:$0xff]   ;;  %v553_v1 = vld [vmem:[#allocation5 + $0x30] sm:$0xff]   ;;  %v554_v2 = vld [vmem:[#allocation5 + $0x28] sm:$0xff]   ;;  %s203_s17 = scalar_lea.vmem [#allocation7], %s440_s27  ;;  %s458_s23 = sshll.u32 %s734_s16, 9 }
  0x4a   : > { %663 = vsyncadd (%p921_p8), [#allocation6], 4294966272  ;;  %469 = vmatprep.subr.bf16.mxu0 %v552_v0  ;;  %v555_v3 = vld [vmem:[#allocation5 + $0x20] sm:$0xff]   ;;  %v206_v5 = vld [vmem:[%s835_s29 + $0x8] sm:$0xff]  ;;  %s349_s22 = sshll.u32 %s203_s17, 4  ;;  %s860_s4 = scalar_lea.hbm %s906_s3, %s458_s23  ;;  %s855_s22 = int_to_ptr.vmem [resolvable:$true] %s349_s22 }
  0x4b   : > { %470 = vmatpush3.bf16.msra.mxu0 %v552_v0  ;;  %v205_v4 = vld [vmem:[%s835_s29] sm:$0xff]  ;;  %v556_v7 = vld [vmem:[#allocation5 + $0x18] sm:$0xff]   ;;  %v557_v8 = vld [vmem:[#allocation5 + $0x10] sm:$0xff]   ;;  %s336_s7 = scalar_lea.sflag [#allocation4], %s829_s26  ;;  %s614_s8 = scalar_lea.vmem %s855_s22, 512 }
  0x4c   : > { %471 = vmatprep.subr.bf16.mxu0 %v553_v1  ;;  %v209_v6 = vpack.c.bf16 %v206_v5, %v205_v4  ;;  %v558_v9 = vld [vmem:[#allocation5 + $0x8] sm:$0xff]   ;;  %v559_v10 = vld [vmem:[#allocation5] sm:$0xff]   ;;  %v207_v11 = vld [vmem:[%s835_s29 + $0x10] sm:$0xff]  ;;  %p615_p3 = scmp.ne.s32.totalorder %s855_s22, %s614_s8  ;;  %p922_p11 = scmp.ne.s32.totalorder %s916_s6, 0 }
  0x4d   : > { %v208_v12 = vld [vmem:[%s835_s29 + $0x18] sm:$0xff]  ;;  %v443_v14 = vld [vmem:[%s905_s2] ss:$0 sm:$0xff]  ;;  %s690_s16 = smov [#allocation7]  }
  0x4e   : > { %485 = vmatprep.mubr.bf16.mxu0 %v209_v6  ;;  %v210_v13 = vpack.c.bf16 %v208_v12, %v207_v11  ;;  %p616_p7 = pnand %p615_p3, %p922_p11  ;;  %s618_s9 = sshll.u32 %s690_s16, 4  ;;  %s619_s9 = int_to_ptr.vmem [resolvable:$false] %s618_s9 }
  0x4f   : > { %472 = vmatpush3.bf16.msra.mxu0 %v553_v1  ;;  %s620_s10 = scalar_lea.vmem %s619_s9, 1024  ;;  %p621_p10 = scmp.lt.s32.totalorder %s855_s22, %s619_s9 }
  0x50   : > { %473 = vmatprep.subr.bf16.mxu0 %v554_v2  ;;  %p617_p12 = pneg %p616_p7  ;;  %p622_p2 = scmp.lt.s32.totalorder %s620_s10, %s614_s8 }
  0x52   : > { %p623_p13 = por %p622_p2, %p621_p10 }
  0x53   : > { %474 = vmatpush3.bf16.msra.mxu0 %v554_v2 }
  0x54   : > { %475 = vmatprep.subr.bf16.mxu0 %v555_v3  ;;  %p624_p0 = pnand %p623_p13, %p617_p12 }
  0x57   : > { %476 = vmatpush3.bf16.msra.mxu0 %v555_v3 }
  0x58   : > { %477 = vmatprep.subr.bf16.mxu0 %v556_v7 }
  0x5b   : > { %478 = vmatpush3.bf16.msra.mxu0 %v556_v7 }
  0x5c   : > { %479 = vmatprep.subr.bf16.mxu0 %v557_v8 }
  0x5f   : > { %480 = vmatpush3.bf16.msra.mxu0 %v557_v8 }
  0x60   : > { %481 = vmatprep.subr.bf16.mxu0 %v558_v9 }
  0x63   : > { %482 = vmatpush3.bf16.msra.mxu0 %v558_v9 }
  0x64   : > { %483 = vmatprep.subr.bf16.mxu0 %v559_v10 }
  0x67   : > { %484 = vmatpush3.bf16.msra.mxu0 %v559_v10 }
  0x6a   : > { %486 = vmatmul.mubr.bf16.vlgmr.msra.gmra.mxu0 %v210_v13 }
 0x12a   : > { %v487_v15 = vpop.f32.mrf.mxu0 }
 0x12b   : > { %v325_v16 = vadd.f32 %v487_v15, %v443_v14 }
 0x12c   : > { %v316_v17 = vpop.f32.mrf.mxu0 }
 0x12d   : > { %333 = vst [vmem:[%s203_s17 + $0x10] sm:$0xff] %v325_v16  ;;  %v317_v18 = vadd.f32 %v443_v14, %v316_v17 }
 0x12e   : > { %v488_v19 = vpop.f32.mrf.mxu0 }
 0x12f   : > { %331 = vst [vmem:[%s203_s17] sm:$0xff] %v317_v18  ;;  %v328_v20 = vadd.f32 %v488_v19, %v443_v14 }
 0x130   : > { %v319_v21 = vpop.f32.mrf.mxu0 }
 0x131   : > { %334 = vst [vmem:[%s203_s17 + $0x18] sm:$0xff] %v328_v20  ;;  %v320_v22 = vadd.f32 %v443_v14, %v319_v21 }
 0x133   : > { %332 = vst [vmem:[%s203_s17 + $0x8] sm:$0xff] %v320_v22 }
 0x134   : > { %627 = shalt.err (!%p624_p0)
}
 0x135   : > { %s628_s11 = scalar_lea.hbm %s860_s4, 512  ;;  %s632_s28 = scalar_lea.hbm %s906_s3, 1024 }
 0x136   : > { %p629_p5 = scmp.ne.s32.totalorder %s860_s4, %s628_s11  ;;  %p633_p4 = scmp.lt.s32.totalorder %s860_s4, %s906_s3 }
 0x137   : > { %p634_p6 = scmp.lt.s32.totalorder %s632_s28, %s628_s11 }
 0x138   : > { %p630_p9 = pnand %p629_p5, %p922_p11 }
 0x139   : > { %p635_p8 = por %p634_p6, %p633_p4 }
 0x13a   : > { %p631_p1 = pneg %p630_p9 }
 0x13c   : > { %p636_p3 = pnand %p635_p8, %p631_p1 }
 0x13e   : > { %639 = shalt.err (!%p636_p3)
}
 0x13f   : > { %s691_s20 = smov 128   ;;  %s692_s17 = smov 8  }
 0x140   : > { %495 = dma.vmem_to_hbm [thread:$0]  (%p922_p11), %s855_s22, 512, %s860_s4, %s336_s7, %s691_s20, %s691_s20, %s692_s17  }
 0x141 PF: > { %s364_s23 = sand.u32 1, %s670_s12   ;;  %p923_p7 = scmp.ne.s32.totalorder %s912_s19, 0 }
 0x142   : > { %p924_p12 = scmp.ge.s32.totalorder %s682_s15, 2  ;;  %s365_s25 = scalar_lea.sflag [#allocation4], %s364_s23 }
 0x144   : > { %p506_p10 = pnand %p924_p12, %p923_p7 }
 0x146   : > { %p507_p2 = pneg %p506_p10 }
 0x148   : > { %665 = dma.done.wait (%p507_p2), %s365_s25, 512  }
 0x149   : > { %667 = vsyncadd (%p507_p2), %s365_s25, 4294966784  ;;  %p17_p13 = scmp.ge.s32.totalorder %s767_s24, 4   ;;  %s925_s12 = smov %s674_s13 }
 0x14a   : > { %s926_s13 = smov %s678_s14  ;;  %s927_s14 = smov %s784_s5 }
 0x14b   : > { %s928_s15 = smov %s767_s24  ;;  %19 = sbr.rel (!%p17_p13) target bundleno = 6 (0x6), region = 81 }
 0x150   :  { %370 = vsyncpa [#allocation3], 1 }
 0x151   :  { %372 = vsyncpa [#allocation3 + $0x1], 1 }
 0x152   :  { %373 = vsyncpa [#allocation6], 1 }
 0x153   :  { %374 = vsyncpa [#allocation4], 1 }
 0x154   :  { %376 = vsyncpa [#allocation4 + $0x1], 1 }

</bundles_post_ra>
